<compile_context>
chip_gen: v7x
topology: tpu7x:2x2x1
jax: 0.10.0
libtpu: 0.0.40
codegen_flags: <defaults>
</compile_context>

<pallas_src>
import functools
import math

import numpy as np
import jax
import jax.numpy as jnp
from jax.experimental import pallas as pl
from jax.experimental.pallas import tpu as pltpu


# --------------------------------------------------------------------------- #
# Stage 1: not_mask cumsums (y_embed, x_embed) via MXU triangular matmuls.    #
# --------------------------------------------------------------------------- #
def _cumsum_embed_kernel(mask_ref, lh_ref, uw_ref, emb_ref, *,
                         block_b, normalize, scale):
    # mask_ref: (block_b, H, W) int8   (1 = padded)
    # lh_ref:   (H, H) bf16 lower-triangular ones
    # uw_ref:   (W, W) bf16 upper-triangular ones
    # emb_ref:  (2, block_b, H, W) f32 ; [0] = y_embed, [1] = x_embed
    _, H, W = mask_ref.shape
    lh = lh_ref[...]
    uw = uw_ref[...]
    # Static per-b loop: temporaries are only (H, W) and are stored immediately, so
    # vreg pressure stays low (block_b <= 8).  Batching these tiny matmuls further is
    # not worth any lowering risk: after the two-stage split this kernel is <2% of the
    # total work.
    for b in range(block_b):
        # int8 -> int32 widen kept on purpose: battle-tested lowering path, and this
        # kernel is completely off the critical path now.
        nm = jnp.where(mask_ref[b].astype(jnp.int32) == 0, 1.0, 0.0
                       ).astype(jnp.bfloat16)                        # not_mask (H, W)
        y = jnp.dot(lh, nm, preferred_element_type=jnp.float32)      # cumsum over H
        x = jnp.dot(nm, uw, preferred_element_type=jnp.float32)      # cumsum over W
        if normalize:
            eps = 1e-6
            # Exact divide of a single (1,W)/(H,1) vector: an approx reciprocal would
            # eat most of the 1e-4 tolerance and saves nothing measurable here.
            y = y * (scale / (y[H - 1:H, :] + eps))
            x = x * (scale / (x[:, W - 1:W] + eps))
        emb_ref[0, b] = y
        emb_ref[1, b] = x


# --------------------------------------------------------------------------- #
# Stage 2: lane-dense sinusoid over (channels, flattened positions).          #
# --------------------------------------------------------------------------- #
def _sine_kernel(emb_ref, inv_ref, ph_ref, out_ref):
    # emb_ref: (1, block_b, 1, P) f32 -- y or x embedding, positions flattened (lane-dense)
    # inv_ref: (Fblk, 1) f32 per-channel 1/dim_t
    # ph_ref:  (Fblk, 1) f32 per-channel phase (0 for even channels, pi/2 for odd)
    # out_ref: (block_b, 1, Fblk, P) f32
    e = emb_ref[0][:, :, None, :]             # (block_b, 1, 1, P)
    inv = inv_ref[...][None, None]            # (1, 1, Fblk, 1)
    ph = ph_ref[...][None, None]              # (1, 1, Fblk, 1)
    # cos(t) == sin(t + pi/2): exactly one transcendental per output element,
    # computed and stored 128-lane dense with full-width vst.
    out_ref[...] = jnp.sin(e * inv + ph)


# --------------------------------------------------------------------------- #
# Block / VMEM sizing helpers.                                                #
# --------------------------------------------------------------------------- #
def _vmem_limit_bytes():
    try:
        cap = int(pltpu.get_tpu_info().vmem_capacity_bytes)
        # 64 MiB on 128-MiB chips (v5e/v6e), 32 MiB on 64-MiB chips (v7x).
        return max(16 * 1024 * 1024, min(64 * 1024 * 1024, cap // 2))
    except Exception:
        return 32 * 1024 * 1024   # safe default on every generation


def _pick_block_b1(B, H, W, budget):
    for bb in range(min(B, 8), 0, -1):
        if B % bb:
            continue
        footprint = (2 * (2 * bb * H * W * 4)       # double-buffered output block
                     + 2 * (bb * H * W)             # double-buffered int8 mask block
                     + 2 * 2 * (H * H + W * W))     # resident bf16 triangular constants
        if footprint <= budget:
            return bb
    return 1


def _pick_blocks_stage2(B, F, P, budget):
    """Returns (batch block, channel tile) for the sine kernel."""
    # Channel tiles must equal F or be a multiple of 8 dividing F (block-shape rule).
    ft_cands = [F] + [d for d in range(8, F, 8) if F % d == 0][::-1]
    for ft in ft_cands:
        for bb in range(min(B, 8), 0, -1):
            if B % bb:
                continue
            footprint = (2 * (bb * ft * P * 4)      # double-buffered output block
                         + 2 * (bb * P * 4)         # double-buffered embed block
                         + 4 * (ft * 4))            # inv / phase constants
            if footprint <= budget:
                return bb, ft
    # Absurdly large H*W: fall back to the smallest tiles and let the compiler decide.
    return 1, ft_cands[-1]


# --------------------------------------------------------------------------- #
# Public wrapper.                                                             #
# --------------------------------------------------------------------------- #
def position_embedding_sine(mask, *, num_pos_feats=64, temperature=10000,
                            normalize=False, scale=None):
    """mask: (B, H, W) bool (True = padding). Returns (B, 2*num_pos_feats, H, W) f32."""
    if scale is not None and normalize is False:
        raise ValueError('normalize should be True if scale is passed')
    if scale is None:
        scale = 2 * math.pi
    if num_pos_feats % 2 != 0:
        raise ValueError('num_pos_feats must be even (sin/cos channel pairs)')

    B, H, W = mask.shape
    F = num_pos_feats
    C = 2 * F
    P = H * W
    vmem_limit = _vmem_limit_bytes()
    budget = (vmem_limit * 3) // 4

    # ---------------- stage 1: cumsum embeddings (MXU triangular matmuls) --------- #
    mask_i8 = mask.astype(jnp.int8)
    lower_h = jnp.asarray(np.tril(np.ones((H, H), np.float32))).astype(jnp.bfloat16)
    upper_w = jnp.asarray(np.triu(np.ones((W, W), np.float32))).astype(jnp.bfloat16)

    bb1 = _pick_block_b1(B, H, W, budget)
    emb = pl.pallas_call(
        functools.partial(_cumsum_embed_kernel, block_b=bb1,
                          normalize=normalize, scale=float(scale)),
        out_shape=jax.ShapeDtypeStruct((2, B, H, W), jnp.float32),
        grid=(B // bb1,),
        in_specs=[
            pl.BlockSpec((bb1, H, W), lambda b: (b, 0, 0)),      # mask block
            pl.BlockSpec((H, H), lambda b: (0, 0)),              # lower-tri (resident)
            pl.BlockSpec((W, W), lambda b: (0, 0)),              # upper-tri (resident)
        ],
        out_specs=pl.BlockSpec((2, bb1, H, W), lambda b: (0, b, 0, 0)),
        compiler_params=pltpu.CompilerParams(
            dimension_semantics=("parallel",),
            vmem_limit_bytes=vmem_limit),
    )(mask_i8, lower_h, upper_w)

    # Free, contiguous reshape: positions become a single lane-dense minor axis.
    emb = emb.reshape(2, B, 1, P)

    # ---------------- stage 2: lane-dense sin over (channels, positions) ---------- #
    chan = np.arange(F)
    dim_t = np.power(float(temperature), 2.0 * (chan // 2) / float(F))
    inv_c = jnp.asarray((1.0 / dim_t).astype(np.float32)[:, None])            # (F, 1)
    ph_c = jnp.asarray(np.where(chan % 2 == 0, 0.0, np.pi / 2.0)
                       .astype(np.float32)[:, None])                          # (F, 1)

    bb2, ft = _pick_blocks_stage2(B, F, P, budget)
    out = pl.pallas_call(
        _sine_kernel,
        out_shape=jax.ShapeDtypeStruct((B, 2, F, P), jnp.float32),
        grid=(B // bb2, 2, F // ft),            # (batch blocks, y/x half, channel tiles)
        in_specs=[
            pl.BlockSpec((1, bb2, 1, P), lambda b, s, f: (s, b, 0, 0)),   # embeddings
            pl.BlockSpec((ft, 1), lambda b, s, f: (f, 0)),                # 1/dim_t
            pl.BlockSpec((ft, 1), lambda b, s, f: (f, 0)),                # phase
        ],
        out_specs=pl.BlockSpec((bb2, 1, ft, P), lambda b, s, f: (b, s, f, 0)),
        compiler_params=pltpu.CompilerParams(
            dimension_semantics=("parallel", "parallel", "parallel"),
            vmem_limit_bytes=vmem_limit),
    )(emb, inv_c, ph_c)

    # Contiguous (free) reshape back to NCHW: channel = [pos_y(F), pos_x(F)].
    return out.reshape(B, C, H, W)


# --------------------------------------------------------------------------- #
# Pure-JAX reference mirroring the PyTorch forward.                           #
# --------------------------------------------------------------------------- #
def _reference(mask, *, num_pos_feats, temperature, normalize, scale):
    if scale is None:
        scale = 2 * math.pi
    not_mask = (~mask).astype(jnp.float32)
    y_embed = jnp.cumsum(not_mask, axis=1)
    x_embed = jnp.cumsum(not_mask, axis=2)
    if normalize:
        eps = 1e-6
        y_embed = y_embed / (y_embed[:, -1:, :] + eps) * scale
        x_embed = x_embed / (x_embed[:, :, -1:] + eps) * scale
    dim_t = jnp.arange(num_pos_feats, dtype=jnp.float32)
    dim_t = temperature ** (2 * jnp.floor(dim_t / 2) / num_pos_feats)
    pos_x = x_embed[:, :, :, None] / dim_t
    pos_y = y_embed[:, :, :, None] / dim_t
    pos_x = jnp.stack((jnp.sin(pos_x[:, :, :, 0::2]),
                       jnp.cos(pos_x[:, :, :, 1::2])), axis=4).reshape(
                           *pos_x.shape[:3], -1)
    pos_y = jnp.stack((jnp.sin(pos_y[:, :, :, 0::2]),
                       jnp.cos(pos_y[:, :, :, 1::2])), axis=4).reshape(
                           *pos_y.shape[:3], -1)
    pos = jnp.concatenate((pos_y, pos_x), axis=3)
    return jnp.transpose(pos, (0, 3, 1, 2))


if __name__ == "__main__":
    B, H, W = 2, 16, 16
    num_pos_feats = 32          # output channels = 64

    key = jax.random.PRNGKey(0)
    kh, kw = jax.random.split(key)
    # Deterministic contiguous padding masks (True = padded), like NestedTensor.
    valid_h = jax.random.randint(kh, (B,), H // 2, H + 1)
    valid_w = jax.random.randint(kw, (B,), W // 2, W + 1)
    hh = jnp.arange(H)[None, :, None]
    ww = jnp.arange(W)[None, None, :]
    mask = (hh >= valid_h[:, None, None]) | (ww >= valid_w[:, None, None])

    for normalize in (False, True):
        out = position_embedding_sine(mask, num_pos_feats=num_pos_feats,
                                      temperature=10000, normalize=normalize)
        out = jax.block_until_ready(out)
        ref = _reference(mask, num_pos_feats=num_pos_feats, temperature=10000,
                         normalize=normalize, scale=None)
        assert out.shape == (B, 2 * num_pos_feats, H, W), out.shape
        assert out.dtype == jnp.float32
        err = float(jnp.max(jnp.abs(out - ref)))
        assert err < 1e-4, (normalize, err)

    print("KERNEL_OK")
</pallas_src>

<mosaic_0001>
module attributes {stable_mosaic.version = 11 : i64} {
  func.func @_cumsum_embed_kernel(%arg0: i32, %arg1: memref<2x16x16xi8, #tpu.memory_space<vmem>>, %arg2: memref<16x16xbf16, #tpu.memory_space<vmem>>, %arg3: memref<16x16xbf16, #tpu.memory_space<vmem>>, %arg4: memref<2x2x16x16xf32, #tpu.memory_space<vmem>>) attributes {dimension_semantics = [#tpu.dimension_semantics<parallel>], iteration_bounds = array<i64: 1>, scalar_prefetch = 0 : i64, scratch_operands = 0 : i64, tpu.core_type = #tpu.core_type<tc>, window_params = [{transform_indices = @transform_0, window_bounds = array<i64: 2, 16, 16>}, {pipeline_mode = #tpu.pipeline_mode<synchronous>, transform_indices = @transform_1, window_bounds = array<i64: 16, 16>}, {pipeline_mode = #tpu.pipeline_mode<synchronous>, transform_indices = @transform_2, window_bounds = array<i64: 16, 16>}, {transform_indices = @transform_3, window_bounds = array<i64: 2, 2, 16, 16>}]} {
    %c0 = arith.constant 0 : index
    %c0_0 = arith.constant 0 : index
    %0 = vector.load %arg2[%c0, %c0_0] : memref<16x16xbf16, #tpu.memory_space<vmem>>, vector<16x16xbf16>
    %c0_1 = arith.constant 0 : index
    %c0_2 = arith.constant 0 : index
    %1 = vector.load %arg3[%c0_1, %c0_2] : memref<16x16xbf16, #tpu.memory_space<vmem>>, vector<16x16xbf16>
    %c0_3 = arith.constant 0 : index
    %c0_4 = arith.constant 0 : index
    %c0_5 = arith.constant 0 : index
    %2 = vector.load %arg1[%c0_3, %c0_4, %c0_5] : memref<2x16x16xi8, #tpu.memory_space<vmem>>, vector<1x16x16xi8>
    %3 = vector.shape_cast %2 : vector<1x16x16xi8> to vector<16x16xi8>
    %4 = arith.extsi %3 : vector<16x16xi8> to vector<16x16xi32>
    %c0_i32 = arith.constant 0 : i32
    %5 = vector.broadcast %c0_i32 : i32 to vector<16x16xi32>
    %6 = arith.cmpi eq, %4, %5 : vector<16x16xi32>
    %cst = arith.constant 1.000000e+00 : f32
    %cst_6 = arith.constant 0.000000e+00 : f32
    %7 = vector.broadcast %cst : f32 to vector<16x16xf32>
    %8 = vector.broadcast %cst_6 : f32 to vector<16x16xf32>
    %9 = arith.select %6, %7, %8 : vector<16x16xi1>, vector<16x16xf32>
    %10 = arith.truncf %9 : vector<16x16xf32> to vector<16x16xbf16>
    %cst_7 = arith.constant dense<0.000000e+00> : vector<16x16xf32>
    %11 = tpu.matmul %0, %10, %cst_7 {dimension_numbers = #tpu.dot_dimension_numbers<[1], [0], [0], [1], [0, 0, 1, 1], [], []>} : vector<16x16xbf16>, vector<16x16xbf16>, vector<16x16xf32> -> vector<16x16xf32>
    %cst_8 = arith.constant dense<0.000000e+00> : vector<16x16xf32>
    %12 = tpu.matmul %10, %1, %cst_8 {dimension_numbers = #tpu.dot_dimension_numbers<[1], [0], [0], [1], [0, 0, 1, 1], [], []>} : vector<16x16xbf16>, vector<16x16xbf16>, vector<16x16xf32> -> vector<16x16xf32>
    %c0_9 = arith.constant 0 : index
    %c0_10 = arith.constant 0 : index
    %c0_11 = arith.constant 0 : index
    %c0_12 = arith.constant 0 : index
    %13 = vector.load %arg4[%c0_9, %c0_10, %c0_11, %c0_12] : memref<2x2x16x16xf32, #tpu.memory_space<vmem>>, vector<1x1x16x16xf32>
    %14 = vector.shape_cast %13 : vector<1x1x16x16xf32> to vector<16x16xf32>
    %15 = vector.shape_cast %11 : vector<16x16xf32> to vector<1x1x16x16xf32>
    tpu.vector_store %arg4[%c0_9, %c0_10, %c0_11, %c0_12], %15 {strides = array<i32>} : memref<2x2x16x16xf32, #tpu.memory_space<vmem>>, vector<1x1x16x16xf32>,
    %c1 = arith.constant 1 : index
    %c0_13 = arith.constant 0 : index
    %c0_14 = arith.constant 0 : index
    %c0_15 = arith.constant 0 : index
    %16 = vector.load %arg4[%c1, %c0_13, %c0_14, %c0_15] : memref<2x2x16x16xf32, #tpu.memory_space<vmem>>, vector<1x1x16x16xf32>
    %17 = vector.shape_cast %16 : vector<1x1x16x16xf32> to vector<16x16xf32>
    %18 = vector.shape_cast %12 : vector<16x16xf32> to vector<1x1x16x16xf32>
    tpu.vector_store %arg4[%c1, %c0_13, %c0_14, %c0_15], %18 {strides = array<i32>} : memref<2x2x16x16xf32, #tpu.memory_space<vmem>>, vector<1x1x16x16xf32>,
    %c1_16 = arith.constant 1 : index
    %c0_17 = arith.constant 0 : index
    %c0_18 = arith.constant 0 : index
    %19 = vector.load %arg1[%c1_16, %c0_17, %c0_18] : memref<2x16x16xi8, #tpu.memory_space<vmem>>, vector<1x16x16xi8>
    %20 = vector.shape_cast %19 : vector<1x16x16xi8> to vector<16x16xi8>
    %21 = arith.extsi %20 : vector<16x16xi8> to vector<16x16xi32>
    %c0_i32_19 = arith.constant 0 : i32
    %22 = vector.broadcast %c0_i32_19 : i32 to vector<16x16xi32>
    %23 = arith.cmpi eq, %21, %22 : vector<16x16xi32>
    %cst_20 = arith.constant 1.000000e+00 : f32
    %cst_21 = arith.constant 0.000000e+00 : f32
    %24 = vector.broadcast %cst_20 : f32 to vector<16x16xf32>
    %25 = vector.broadcast %cst_21 : f32 to vector<16x16xf32>
    %26 = arith.select %23, %24, %25 : vector<16x16xi1>, vector<16x16xf32>
    %27 = arith.truncf %26 : vector<16x16xf32> to vector<16x16xbf16>
    %cst_22 = arith.constant dense<0.000000e+00> : vector<16x16xf32>
    %28 = tpu.matmul %0, %27, %cst_22 {dimension_numbers = #tpu.dot_dimension_numbers<[1], [0], [0], [1], [0, 0, 1, 1], [], []>} : vector<16x16xbf16>, vector<16x16xbf16>, vector<16x16xf32> -> vector<16x16xf32>
    %cst_23 = arith.constant dense<0.000000e+00> : vector<16x16xf32>
    %29 = tpu.matmul %27, %1, %cst_23 {dimension_numbers = #tpu.dot_dimension_numbers<[1], [0], [0], [1], [0, 0, 1, 1], [], []>} : vector<16x16xbf16>, vector<16x16xbf16>, vector<16x16xf32> -> vector<16x16xf32>
    %c0_24 = arith.constant 0 : index
    %c1_25 = arith.constant 1 : index
    %c0_26 = arith.constant 0 : index
    %c0_27 = arith.constant 0 : index
    %30 = vector.load %arg4[%c0_24, %c1_25, %c0_26, %c0_27] : memref<2x2x16x16xf32, #tpu.memory_space<vmem>>, vector<1x1x16x16xf32>
    %31 = vector.shape_cast %30 : vector<1x1x16x16xf32> to vector<16x16xf32>
    %32 = vector.shape_cast %28 : vector<16x16xf32> to vector<1x1x16x16xf32>
    tpu.vector_store %arg4[%c0_24, %c1_25, %c0_26, %c0_27], %32 {strides = array<i32>} : memref<2x2x16x16xf32, #tpu.memory_space<vmem>>, vector<1x1x16x16xf32>,
    %c1_28 = arith.constant 1 : index
    %c1_29 = arith.constant 1 : index
    %c0_30 = arith.constant 0 : index
    %c0_31 = arith.constant 0 : index
    %33 = vector.load %arg4[%c1_28, %c1_29, %c0_30, %c0_31] : memref<2x2x16x16xf32, #tpu.memory_space<vmem>>, vector<1x1x16x16xf32>
    %34 = vector.shape_cast %33 : vector<1x1x16x16xf32> to vector<16x16xf32>
    %35 = vector.shape_cast %29 : vector<16x16xf32> to vector<1x1x16x16xf32>
    tpu.vector_store %arg4[%c1_28, %c1_29, %c0_30, %c0_31], %35 {strides = array<i32>} : memref<2x2x16x16xf32, #tpu.memory_space<vmem>>, vector<1x1x16x16xf32>,
    return
  }
  func.func @transform_0(%arg0: i32) -> (i32, i32, i32) {
    %c0_i32 = arith.constant 0 : i32
    %c0_i32_0 = arith.constant 0 : i32
    %c0_i32_1 = arith.constant 0 : i32
    return %arg0, %c0_i32, %c0_i32_0 : i32, i32, i32
  }
  func.func @transform_1(%arg0: i32) -> (i32, i32) {
    %c0_i32 = arith.constant 0 : i32
    %c0_i32_0 = arith.constant 0 : i32
    %c0_i32_1 = arith.constant 0 : i32
    return %c0_i32, %c0_i32_0 : i32, i32
  }
  func.func @transform_2(%arg0: i32) -> (i32, i32) {
    %c0_i32 = arith.constant 0 : i32
    %c0_i32_0 = arith.constant 0 : i32
    %c0_i32_1 = arith.constant 0 : i32
    return %c0_i32, %c0_i32_0 : i32, i32
  }
  func.func @transform_3(%arg0: i32) -> (i32, i32, i32, i32) {
    %c0_i32 = arith.constant 0 : i32
    %c0_i32_0 = arith.constant 0 : i32
    %c0_i32_1 = arith.constant 0 : i32
    %c0_i32_2 = arith.constant 0 : i32
    return %c0_i32, %arg0, %c0_i32_0, %c0_i32_1 : i32, i32, i32, i32
  }
}

</mosaic_0001>

<bundles_post_ra>
// kernel: tpu_custom_call.1
= control target key start
LH: loop header
LB: loop body
LE: loop exit
PB: predicated region body
PF: predicated region fallthrough
CT: control target
= control target key end

     0   :  { %8 = vsyncpa [#allocation3], 0  ;;  %s572_s0 = inlined_call_operand.hbm [shape: s8[2,16,16], index: 0, kind: input, shape index: {}]   ;;  %s573_s1 = inlined_call_operand.hbm [shape: bf16[16,16], index: 1, kind: input, shape index: {}]   ;;  %s574_s2 = inlined_call_operand.hbm [shape: bf16[16,16], index: 2, kind: input, shape index: {}]   ;;  %s575_s3 = inlined_call_operand.hbm [shape: f32[2,2,16,16], index: 3, kind: output, shape index: {}]  }
   0x1   :  { %9 = vsyncpa [#allocation6], 0 }
   0x2   :  { %10 = vsyncpa [#allocation4], 0  ;;  %s453_s12 = smov [#allocation5]   ;;  %s359_s16 = scalar_lea.hbm %s573_s1, 128 }
   0x3   :  { %s28_s13 = sshll.u32 %s453_s12, 4  ;;  %p360_p0 = scmp.ne.s32.totalorder %s573_s1, %s359_s16  ;;  %s29_s13 = int_to_ptr.vmem [resolvable:$true] %s28_s13 }
   0x4   :  { %p363_p1 = scmp.lt.u32.totalorder %s359_s16, %s573_s1 }
   0x6   :  { %p365_p2 = pnand %p363_p1, %p360_p0 }
   0x8   :  { %368 = shalt.err (!%p365_p2)
}
   0x9   :  { %s369_s21 = scalar_lea.vmem %s29_s13, 128  ;;  %p374_p4 = scmp.lt.s32.totalorder %s29_s13, %s29_s13 }
   0xa   :  { %p370_p3 = scmp.ne.s32.totalorder %s29_s13, %s369_s21  ;;  %p375_p5 = scmp.lt.s32.totalorder %s369_s21, %s369_s21 }
   0xc   :  { %p376_p6 = por %p375_p5, %p374_p4 }
   0xe   :  { %p377_p7 = pnand %p376_p6, %p370_p3 }
  0x10   :  { %380 = shalt.err (!%p377_p7)
}
  0x11   :  { %s454_s22 = smov 64   ;;  %s455_s23 = smov 4  }
  0x12   :  { %34 = dma.hbm_to_vmem [thread:$0]  %s573_s1, 128, %s29_s13, [#allocation6], %s454_s22, %s454_s22, %s455_s23  }
  0x13   :  { %s456_s26 = smov [#allocation2]   ;;  %s381_s30 = scalar_lea.hbm %s572_s0, 128 }
  0x14   :  { %s16_s27 = sshll.u32 %s456_s26, 4  ;;  %p382_p8 = scmp.ne.s32.totalorder %s572_s0, %s381_s30  ;;  %s17_s27 = int_to_ptr.vmem [resolvable:$true] %s16_s27 }
  0x15   :  { %p385_p9 = scmp.lt.u32.totalorder %s381_s30, %s572_s0 }
  0x17   :  { %p387_p10 = pnand %p385_p9, %p382_p8 }
  0x19   :  { %390 = shalt.err (!%p387_p10)
}
  0x1a   :  { %s391_s8 = scalar_lea.vmem %s17_s27, 128  ;;  %p396_p12 = scmp.lt.s32.totalorder %s17_s27, %s17_s27 }
  0x1b   :  { %p392_p11 = scmp.ne.s32.totalorder %s17_s27, %s391_s8  ;;  %p397_p13 = scmp.lt.s32.totalorder %s391_s8, %s391_s8 }
  0x1d   :  { %p398_p0 = por %p397_p13, %p396_p12 }
  0x1f   :  { %p399_p1 = pnand %p398_p0, %p392_p11 }
  0x21   :  { %402 = shalt.err (!%p399_p1)
}
  0x22   :  { %s457_s1 = smov 32   ;;  %s458_s9 = smov 2  }
  0x23   :  { %22 = dma.hbm_to_vmem [thread:$0]  %s572_s0, 128, %s17_s27, [#allocation3], %s457_s1, %s457_s1, %s458_s9  }
  0x24   :  { %s459_s12 = smov [#allocation7]   ;;  %s403_s16 = scalar_lea.hbm %s574_s2, 128 }
  0x25   :  { %s40_s13 = sshll.u32 %s459_s12, 4  ;;  %p404_p2 = scmp.ne.s32.totalorder %s574_s2, %s403_s16  ;;  %s41_s13 = int_to_ptr.vmem [resolvable:$true] %s40_s13 }
  0x26   :  { %p407_p3 = scmp.lt.u32.totalorder %s403_s16, %s574_s2 }
  0x28   :  { %p409_p4 = pnand %p407_p3, %p404_p2 }
  0x2a   :  { %412 = shalt.err (!%p409_p4)
}
  0x2b   :  { %s413_s21 = scalar_lea.vmem %s41_s13, 128  ;;  %p418_p6 = scmp.lt.s32.totalorder %s41_s13, %s41_s13 }
  0x2c   :  { %p414_p5 = scmp.ne.s32.totalorder %s41_s13, %s413_s21  ;;  %p419_p7 = scmp.lt.s32.totalorder %s413_s21, %s413_s21 }
  0x2e   :  { %p420_p8 = por %p419_p7, %p418_p6 }
  0x30   :  { %p421_p9 = pnand %p420_p8, %p414_p5 }
  0x32   :  { %424 = shalt.err (!%p421_p9)
}
  0x33   :  { %46 = dma.hbm_to_vmem [thread:$0]  %s574_s2, 128, %s41_s13, [#allocation6], %s454_s22, %s454_s22, %s455_s23  }
  0x34   :  { %447 = dma.done.wait [#allocation3], 128  }
  0x35   :  { %448 = vsyncadd [#allocation3], 4294967168 }
  0x36   :  { %449 = dma.done.wait [#allocation6], 256  }
  0x37   :  { %450 = vsyncadd [#allocation6], 4294967040  ;;  %v460_v0 = vmov 0.0   ;;  %vm461_vm0 = vmmov 0   ;;  %v357_v1 = vld [vmem:[#allocation7] sm:$0xff]   ;;  %v305_v2 = vld [vmem:[#allocation2] sm:$0xff]  }
  0x38   :  { %326 = vmatprep.subr.bf16.mxu1 %v460_v0  ;;  %320 = vmatprep.subr.bf16.mxu0 %v460_v0  ;;  %v306_v3 = vunpack.c.0.s8 %v305_v2  ;;  %v307_v4 = vunpack.c.1.s8 %v305_v2  ;;  %v310_v5 = vunpack.c.2.s8 %v305_v2  ;;  %v311_v6 = vunpack.c.3.s8 %v305_v2  ;;  %v358_v11 = vld [vmem:[#allocation5] sm:$0xff]   ;;  %s463_s2 = smov [#allocation8]  }
  0x39   :  { %328 = vmatprep.mubr.msk.bf16.mxu1 %vm461_vm0, %v460_v0  ;;  %322 = vmatprep.mubr.msk.bf16.mxu0 %vm461_vm0, %v460_v0  ;;  %vm75_vm6 = vcmask 130048   ;;  %v462_v13 = vmov 1.0|1.0   ;;  %s281_s22 = sshll.u32 %s463_s2, 4  ;;  %s282_s22 = int_to_ptr.vmem [resolvable:$true] %s281_s22 }
  0x3a   :  { %327 = vmatpush3.bf16.msra.mxu1 %v357_v1  ;;  %vm65_vm1 = vcmp.eq.s32.totalorder %v306_v3, 0  ;;  %vm66_vm2 = vcmp.eq.s32.totalorder %v307_v4, 0  ;;  %vm530_vm3 = vcmp.eq.s32.totalorder %v310_v5, 0  ;;  %vm534_vm4 = vcmp.eq.s32.totalorder %v311_v6, 0  ;;  %s425_s23 = scalar_lea.vmem %s282_s22, 1024  ;;  %p430_p11 = scmp.lt.s32.totalorder %s282_s22, %s282_s22 }
  0x3b   :  { %338 = vmatprep.subr.bf16.mxu1 %v460_v0  ;;  %v67_v9 = vsel %vm65_vm1, 1.0, %v460_v0  ;;  %v68_v10 = vsel %vm66_vm2, 1.0, %v460_v0  ;;  %vm295_vm5 = vmpackc.low %vm66_vm2, %vm65_vm1  ;;  %v182_v14 = vsel %vm530_vm3, 1.0, %v460_v0  ;;  %v183_v15 = vsel %vm534_vm4, 1.0, %v460_v0  ;;  %p426_p10 = scmp.ne.s32.totalorder %s282_s22, %s425_s23  ;;  %p431_p12 = scmp.lt.s32.totalorder %s425_s23, %s425_s23 }
  0x3c   :  { %v69_v12 = vpack.c.bf16 %v68_v10, %v67_v9  ;;  %321 = vmatpush3.bf16.msk.msra.mxu0 %vm295_vm5, %v462_v13  ;;  %vm300_vm7 = vmpackc.low %vm534_vm4, %vm530_vm3  ;;  %v184_v16 = vpack.c.bf16 %v183_v15, %v182_v14 }
  0x3d   :  { %332 = vmatprep.subr.bf16.mxu0 %v460_v0  ;;  %p432_p13 = por %p431_p12, %p430_p11 }
  0x3e   :  { %329 = vmatmul.mubr.msk.bf16.vlgmr.msra.gmra.mrb[0].mxu1 %vm75_vm6, %v69_v12 }
  0x3f   :  { %323 = vmatmul.mubr.msk.bf16.vlgmr.msra.gmra.mrb[0].mxu0 %vm75_vm6, %v358_v11  ;;  %339 = vmatpush3.bf16.msra.mxu1 %v357_v1  ;;  %p433_p0 = pnand %p432_p13, %p426_p10 }
  0x40   :  { %333 = vmatpush3.bf16.msk.msra.mxu0 %vm300_vm7, %v462_v13  ;;  %340 = vmatprep.mubr.msk.bf16.mxu1 %vm461_vm0, %v460_v0 }
  0x41   :  { %334 = vmatprep.mubr.msk.bf16.mxu0 %vm461_vm0, %v460_v0 }
  0x46   :  { %341 = vmatmul.mubr.msk.bf16.vlgmr.msra.gmra.mrb[4].mxu1 %vm75_vm6, %v184_v16 }
  0x47   :  { %335 = vmatmul.mubr.msk.bf16.vlgmr.msra.gmra.mrb[4].mxu0 %vm75_vm6, %v358_v11 }
 0x111   :  { %v163_v17 = vpop.f32.mrb[0].mxu1 }
 0x112   :  { %173 = vst.msk [vmem:[#allocation8 + $0x20] sm:$0xff] %vm75_vm6, %v163_v17  ;;  %v113_v18 = vpop.f32.mrb[0].mxu0  ;;  %v330_v19 = vpop.f32.mrb[1].mxu1 }
 0x113   :  { %170 = vst.msk [vmem:[#allocation8] sm:$0xff] %vm75_vm6, %v113_v18  ;;  %v324_v20 = vpop.f32.mrb[1].mxu0  ;;  %v166_v21 = vpop.f32.mrb[2].mxu1 }
 0x114   :  { %174 = vst.msk [vmem:[#allocation8 + $0x28] sm:$0xff] %vm75_vm6, %v166_v21  ;;  %v116_v22 = vpop.f32.mrb[2].mxu0  ;;  %v331_v23 = vpop.f32.mrb[3].mxu1 }
 0x115   :  { %171 = vst.msk [vmem:[#allocation8 + $0x8] sm:$0xff] %vm75_vm6, %v116_v22  ;;  %v325_v24 = vpop.f32.mrb[3].mxu0 }
 0x119   :  { %v263_v25 = vpop.f32.mrb[4].mxu1 }
 0x11a   :  { %274 = vst.msk [vmem:[#allocation8 + $0x30] sm:$0xff] %vm75_vm6, %v263_v25  ;;  %v219_v26 = vpop.f32.mrb[4].mxu0  ;;  %v342_v27 = vpop.f32.mrb[5].mxu1 }
 0x11b   :  { %271 = vst.msk [vmem:[#allocation8 + $0x10] sm:$0xff] %vm75_vm6, %v219_v26  ;;  %v336_v28 = vpop.f32.mrb[5].mxu0  ;;  %v266_v29 = vpop.f32.mrb[6].mxu1 }
 0x11c   :  { %275 = vst.msk [vmem:[#allocation8 + $0x38] sm:$0xff] %vm75_vm6, %v266_v29  ;;  %v222_v30 = vpop.f32.mrb[6].mxu0  ;;  %v343_v31 = vpop.f32.mrb[7].mxu1 }
 0x11d   :  { %272 = vst.msk [vmem:[#allocation8 + $0x18] sm:$0xff] %vm75_vm6, %v222_v30  ;;  %v337_v32 = vpop.f32.mrb[7].mxu0 }
 0x11e   :  { %436 = shalt.err (!%p433_p0)
}
 0x11f   :  { %s437_s27 = scalar_lea.hbm %s575_s3, 1024 }
 0x120   :  { %p438_p1 = scmp.ne.s32.totalorder %s575_s3, %s437_s27  ;;  %p441_p2 = scmp.lt.u32.totalorder %s437_s27, %s575_s3 }
 0x122   :  { %p443_p3 = pnand %p441_p2, %p438_p1 }
 0x124   :  { %446 = shalt.err (!%p443_p3)
}
 0x125   :  { %s464_s5 = smov 128   ;;  %s465_s6 = smov 8  }
 0x126   :  { %287 = dma.vmem_to_hbm [thread:$0]  %s282_s22, 1024, %s575_s3, [#allocation4], %s464_s5, %s464_s5, %s465_s6  }
 0x127   :  { %451 = dma.done.wait [#allocation4], 1024  }
 0x128   :  { %452 = vsyncadd [#allocation4], 4294966272 }
 0x129   :  { %291 = vsyncpa [#allocation3], 1 }
 0x12a   :  { %292 = vsyncpa [#allocation6], 1 }
 0x12b   :  { %293 = vsyncpa [#allocation4], 1 }

</bundles_post_ra>
